<compile_context>
chip_gen: v7x
topology: tpu7x:2x2x1
jax: 0.10.0
libtpu: 0.0.40
codegen_flags: <defaults>
</compile_context>

<pallas_src>
import functools

import jax
import jax.numpy as jnp
from jax.experimental import pallas as pl
from jax.experimental.pallas import tpu as pltpu

_INV_SQRT2 = 0.7071067811865476


def _gelu_exact_f32(h):
    # Exact erf-GELU, matches torch.nn.GELU() default.
    return 0.5 * h * (1.0 + jax.lax.erf(h * jnp.float32(_INV_SQRT2)))


# ---------------------------------------------------------------------------
# Kernels
# ---------------------------------------------------------------------------
def _mlp_kernel_resident(x_ref, wfc_ref, bfc_ref, wproj_ref, bproj_ref, o_ref):
    """Weights fully resident in VMEM; one token tile per grid step."""
    h = jnp.dot(x_ref[...], wfc_ref[...], preferred_element_type=jnp.float32)
    h = h + bfc_ref[...].astype(jnp.float32)
    h = _gelu_exact_f32(h)
    out = jnp.dot(h.astype(wproj_ref.dtype), wproj_ref[...],
                  preferred_element_type=jnp.float32)
    out = out + bproj_ref[...].astype(jnp.float32)
    # dropout: inference mode -> identity.
    o_ref[...] = out.astype(o_ref.dtype)


def _mlp_kernel_htiled(x_ref, wfc_ref, bfc_ref, wproj_ref, bproj_ref, o_ref, acc_ref):
    """One (token-tile, hidden-slab) step: gelu(x @ Wfc_h + bfc_h) @ Wproj_h, accumulated."""
    j = pl.program_id(1)

    @pl.when(j == 0)
    def _init():
        acc_ref[...] = jnp.zeros_like(acc_ref)

    h = jnp.dot(x_ref[...], wfc_ref[...], preferred_element_type=jnp.float32)
    h = h + bfc_ref[...].astype(jnp.float32)
    h = _gelu_exact_f32(h)
    acc_ref[...] += jnp.dot(h.astype(wproj_ref.dtype), wproj_ref[...],
                            preferred_element_type=jnp.float32)

    @pl.when(j == pl.num_programs(1) - 1)
    def _finalize():
        out = acc_ref[...] + bproj_ref[...].astype(jnp.float32)
        # dropout: inference mode -> identity.
        o_ref[...] = out.astype(o_ref.dtype)


# ---------------------------------------------------------------------------
# Host-side planning helpers
# ---------------------------------------------------------------------------
def _round_up(x, m):
    return ((x + m - 1) // m) * m


def _cdiv(a, b):
    return (a + b - 1) // b


def _pad2d(a, shape):
    if tuple(a.shape) == tuple(shape):
        return a
    return jnp.zeros(shape, a.dtype).at[: a.shape[0], : a.shape[1]].set(a)


def _device_plan():
    """Per-generation token-tile target, VMEM request and TC count."""
    try:
        kind = jax.devices()[0].device_kind.lower()
    except Exception:  # pragma: no cover - defensive
        kind = ""
    if "7" in kind:
        # v7x: 64 MiB physical VMEM / TC, 2 TCs/chip, ~3.2 TB/s HBM (lower AI knee).
        return dict(bm_target=512, vmem_limit=48 * 1024 * 1024, num_tc=2)
    if "v6" in kind:
        # v6e: 918 TF/s / ~1.4 TB/s -> need ~650 flops per weight byte; 128 MiB VMEM.
        return dict(bm_target=768, vmem_limit=96 * 1024 * 1024, num_tc=1)
    if "v5" in kind:
        # v5e: 197 TF/s / 0.82 TB/s -> knee ~240 flops/byte; 512 gives headroom.
        return dict(bm_target=512, vmem_limit=96 * 1024 * 1024, num_tc=1)
    return dict(bm_target=512, vmem_limit=64 * 1024 * 1024, num_tc=1)


# ---------------------------------------------------------------------------
# Wrapper
# ---------------------------------------------------------------------------
@functools.partial(jax.jit, static_argnames=("block_m", "block_h"))
def mlp_pallas(x, w_fc, b_fc, w_proj, b_proj, *, block_m=None, block_h=512):
    """x: [B, T, C]; w_fc: [C, 4C]; b_fc: [4C]; w_proj: [4C, C]; b_proj: [C]."""
    B, T, C = x.shape
    H = w_fc.shape[1]
    M = B * T

    plan = _device_plan()
    bm_target = block_m if block_m is not None else plan["bm_target"]
    vmem_limit = plan["vmem_limit"]
    num_tc = plan["num_tc"]
    budget = int(0.75 * vmem_limit)

    x_isz = jnp.dtype(x.dtype).itemsize
    w_isz = jnp.dtype(w_fc.dtype).itemsize
    o_isz = x_isz
    sub = {4: 8, 2: 16, 1: 32}.get(x_isz, 8)

    Cp = _round_up(C, 128)

    # Token tile: as large as the roofline wants, but no larger than the data
    # (clamping avoids a big zero-padded copy of x for short sequences).
    bm = min(_round_up(bm_target, sub), _round_up(M, sub))
    # v7x megacore: keep >= 2 token tiles so both TensorCores get work.
    if num_tc >= 2 and M > sub and _cdiv(M, bm) < 2:
        bm = _round_up(_cdiv(M, 2), sub)

    # ------------------------------------------------------------------
    # Path A: weight-resident — weights DMA'd once, grid over tokens only.
    # ------------------------------------------------------------------
    Hp_res = _round_up(H, 128)
    resident_bytes = (
        2 * (2 * Cp * Hp_res + Hp_res + Cp) * w_isz        # both weights + biases (x2 buf)
        + 2 * bm * Cp * (x_isz + o_isz)                    # x tile + out tile (x2 buf)
        + bm * Hp_res * 4 + bm * Cp * 4                    # f32 intermediates
    )
    if resident_bytes <= budget:
        Hp = Hp_res
        Mp = _round_up(M, bm)
        x2d = _pad2d(x.reshape(M, C), (Mp, Cp))
        wfc = _pad2d(w_fc, (Cp, Hp))
        bfc = _pad2d(b_fc.reshape(1, H), (1, Hp))
        wpj = _pad2d(w_proj, (Hp, Cp))
        bpj = _pad2d(b_proj.reshape(1, C), (1, Cp))

        cost = pl.CostEstimate(
            flops=4 * Mp * Cp * Hp,
            transcendentals=Mp * Hp,
            bytes_accessed=(Mp * Cp * x_isz
                            + (2 * Cp * Hp + Hp + Cp) * w_isz   # weights read once
                            + Mp * Cp * o_isz),
        )

        out2d = pl.pallas_call(
            _mlp_kernel_resident,
            out_shape=jax.ShapeDtypeStruct((Mp, Cp), x.dtype),
            grid_spec=pltpu.PrefetchScalarGridSpec(
                num_scalar_prefetch=0,
                grid=(Mp // bm,),
                in_specs=[
                    pl.BlockSpec((bm, Cp), lambda i: (i, 0)),   # x tile
                    pl.BlockSpec((Cp, Hp), lambda i: (0, 0)),   # w_fc (resident)
                    pl.BlockSpec((1, Hp), lambda i: (0, 0)),    # b_fc
                    pl.BlockSpec((Hp, Cp), lambda i: (0, 0)),   # w_proj (resident)
                    pl.BlockSpec((1, Cp), lambda i: (0, 0)),    # b_proj
                ],
                out_specs=pl.BlockSpec((bm, Cp), lambda i: (i, 0)),
            ),
            compiler_params=pltpu.CompilerParams(
                dimension_semantics=("parallel",),
                vmem_limit_bytes=vmem_limit,
            ),
            cost_estimate=cost,
        )(x2d, wfc, bfc, wpj, bpj)
        return out2d[:M, :C].reshape(B, T, C)

    # ------------------------------------------------------------------
    # Path B: hidden dim tiled ("arbitrary" innermost reduction axis).
    # ------------------------------------------------------------------
    bh = min(_round_up(block_h, 128), _round_up(H, 128))

    def _tiled_bytes(bm_, bh_):
        return (2 * bm_ * Cp * x_isz          # x tile (double buffered)
                + 2 * Cp * bh_ * w_isz        # w_fc slab
                + 2 * bh_ * w_isz             # b_fc slab
                + 2 * bh_ * Cp * w_isz        # w_proj slab
                + 2 * Cp * w_isz              # b_proj
                + 2 * bm_ * Cp * o_isz        # out tile
                + bm_ * Cp * 4                # f32 accumulator scratch
                + bm_ * bh_ * 4)              # f32 hidden intermediate

    # Shrink hidden slab first (keeps the token tile — and arithmetic intensity —
    # large), then the token tile, until the tiles fit the VMEM budget.
    while _tiled_bytes(bm, bh) > budget and (bh > 128 or bm > sub):
        if bh > 128:
            bh = max(128, _round_up(bh // 2, 128))
        else:
            bm = max(sub, _round_up(bm // 2, sub))
    # TODO(synk): for very wide models (C >= ~8192) add a C-tile on the output axis
    # instead of shrinking bm further.

    Hp = _round_up(H, bh)        # pad H up to a multiple of the slab (never bh = Hp blowup)
    Mp = _round_up(M, bm)
    n_mtiles = Mp // bm

    x2d = _pad2d(x.reshape(M, C), (Mp, Cp))
    wfc = _pad2d(w_fc, (Cp, Hp))
    bfc = _pad2d(b_fc.reshape(1, H), (1, Hp))
    wpj = _pad2d(w_proj, (Hp, Cp))
    bpj = _pad2d(b_proj.reshape(1, C), (1, Cp))

    cost = pl.CostEstimate(
        flops=4 * Mp * Cp * Hp,
        transcendentals=Mp * Hp,
        bytes_accessed=(Mp * Cp * x_isz
                        + n_mtiles * (2 * Cp * Hp + Hp + Cp) * w_isz  # weights re-streamed
                        + Mp * Cp * o_isz),
    )

    out2d = pl.pallas_call(
        _mlp_kernel_htiled,
        out_shape=jax.ShapeDtypeStruct((Mp, Cp), x.dtype),
        grid_spec=pltpu.PrefetchScalarGridSpec(
            num_scalar_prefetch=0,
            grid=(n_mtiles, Hp // bh),                            # (tokens, hidden-slabs)
            in_specs=[
                pl.BlockSpec((bm, Cp), lambda i, j: (i, 0)),      # x tile (resident over H)
                pl.BlockSpec((Cp, bh), lambda i, j: (0, j)),      # w_fc hidden slab
                pl.BlockSpec((1, bh), lambda i, j: (0, j)),       # b_fc hidden slab
                pl.BlockSpec((bh, Cp), lambda i, j: (j, 0)),      # w_proj hidden slab
                pl.BlockSpec((1, Cp), lambda i, j: (0, 0)),       # b_proj
            ],
            out_specs=pl.BlockSpec((bm, Cp), lambda i, j: (i, 0)),
            scratch_shapes=[pltpu.VMEM((bm, Cp), jnp.float32)],   # f32 accumulator
        ),
        compiler_params=pltpu.CompilerParams(
            dimension_semantics=("parallel", "arbitrary"),
            vmem_limit_bytes=vmem_limit,
        ),
        cost_estimate=cost,
    )(x2d, wfc, bfc, wpj, bpj)

    return out2d[:M, :C].reshape(B, T, C)


def mlp_reference(x, w_fc, b_fc, w_proj, b_proj):
    h = jnp.einsum("btc,ch->bth", x, w_fc) + b_fc
    h = 0.5 * h * (1.0 + jax.lax.erf(h / jnp.sqrt(2.0)))
    return jnp.einsum("bth,hc->btc", h, w_proj) + b_proj


if __name__ == "__main__":
    # Small GPT-config-like shapes: batch=2, seq=8, n_embd=32, hidden=4*32=128.
    B, T, C = 2, 8, 32
    H = 4 * C

    key = jax.random.PRNGKey(0)
    kx, k1, k2, k3, k4 = jax.random.split(key, 5)

    x = jax.random.normal(kx, (B, T, C), dtype=jnp.float32)
    # Deterministic Linear-style init (uniform in +-1/sqrt(fan_in)).
    w_fc = jax.random.uniform(k1, (C, H), jnp.float32, -1.0, 1.0) / jnp.sqrt(C)
    b_fc = jax.random.uniform(k2, (H,), jnp.float32, -1.0, 1.0) / jnp.sqrt(C)
    w_proj = jax.random.uniform(k3, (H, C), jnp.float32, -1.0, 1.0) / jnp.sqrt(H)
    b_proj = jax.random.uniform(k4, (C,), jnp.float32, -1.0, 1.0) / jnp.sqrt(H)

    # TODO(synk): dropout implemented as identity (inference mode); training-mode
    # stochastic dropout would use pltpu.prng_seed + pltpu.prng_random_bits.

    out = jax.block_until_ready(mlp_pallas(x, w_fc, b_fc, w_proj, b_proj))
    ref = mlp_reference(x, w_fc, b_fc, w_proj, b_proj)

    assert out.shape == (B, T, C)
    max_err = float(jnp.max(jnp.abs(out - ref)))
    # Tolerance covers the MXU's default-precision f32 matmul path vs the XLA
    # reference (both are bf16-pass based on TPU); structural errors would be >> this.
    assert jnp.allclose(out, ref, atol=2e-2, rtol=2e-2), max_err

    print("KERNEL_OK")
</pallas_src>

<mosaic_0001>
module attributes {stable_mosaic.version = 11 : i64} {
  func.func @_mlp_kernel_resident(%arg0: i32, %arg1: memref<16x128xf32, #tpu.memory_space<vmem>>, %arg2: memref<128x128xf32, #tpu.memory_space<vmem>>, %arg3: memref<1x128xf32, #tpu.memory_space<vmem>>, %arg4: memref<128x128xf32, #tpu.memory_space<vmem>>, %arg5: memref<1x128xf32, #tpu.memory_space<vmem>>, %arg6: memref<16x128xf32, #tpu.memory_space<vmem>>) attributes {dimension_semantics = [#tpu.dimension_semantics<parallel>], iteration_bounds = array<i64: 1>, scalar_prefetch = 0 : i64, scratch_operands = 0 : i64, tpu.core_type = #tpu.core_type<tc>, window_params = [{transform_indices = @transform_0, window_bounds = array<i64: 16, 128>}, {pipeline_mode = #tpu.pipeline_mode<synchronous>, transform_indices = @transform_1, window_bounds = array<i64: 128, 128>}, {pipeline_mode = #tpu.pipeline_mode<synchronous>, transform_indices = @transform_2, window_bounds = array<i64: 1, 128>}, {pipeline_mode = #tpu.pipeline_mode<synchronous>, transform_indices = @transform_3, window_bounds = array<i64: 128, 128>}, {pipeline_mode = #tpu.pipeline_mode<synchronous>, transform_indices = @transform_4, window_bounds = array<i64: 1, 128>}, {transform_indices = @transform_5, window_bounds = array<i64: 16, 128>}]} {
    %c0 = arith.constant 0 : index
    %c0_0 = arith.constant 0 : index
    %0 = vector.load %arg1[%c0, %c0_0] : memref<16x128xf32, #tpu.memory_space<vmem>>, vector<16x128xf32>
    %c0_1 = arith.constant 0 : index
    %c0_2 = arith.constant 0 : index
    %1 = vector.load %arg2[%c0_1, %c0_2] : memref<128x128xf32, #tpu.memory_space<vmem>>, vector<128x128xf32>
    %cst = arith.constant dense<0.000000e+00> : vector<16x128xf32>
    %2 = tpu.matmul %0, %1, %cst {dimension_numbers = #tpu.dot_dimension_numbers<[1], [0], [0], [1], [0, 0, 1, 1], [], []>} : vector<16x128xf32>, vector<128x128xf32>, vector<16x128xf32> -> vector<16x128xf32>
    %c0_3 = arith.constant 0 : index
    %c0_4 = arith.constant 0 : index
    %3 = vector.load %arg3[%c0_3, %c0_4] : memref<1x128xf32, #tpu.memory_space<vmem>>, vector<1x128xf32>
    %4 = vector.broadcast %3 : vector<1x128xf32> to vector<16x128xf32>
    %5 = arith.addf %2, %4 : vector<16x128xf32>
    %cst_5 = arith.constant 5.000000e-01 : f32
    %6 = vector.broadcast %cst_5 : f32 to vector<16x128xf32>
    %7 = arith.mulf %6, %5 : vector<16x128xf32>
    %cst_6 = arith.constant 0.707106769 : f32
    %8 = vector.broadcast %cst_6 : f32 to vector<16x128xf32>
    %9 = arith.mulf %5, %8 : vector<16x128xf32>
    %10 = math.erf %9 : vector<16x128xf32>
    %cst_7 = arith.constant 1.000000e+00 : f32
    %11 = vector.broadcast %cst_7 : f32 to vector<16x128xf32>
    %12 = arith.addf %11, %10 : vector<16x128xf32>
    %13 = arith.mulf %7, %12 : vector<16x128xf32>
    %c0_8 = arith.constant 0 : index
    %c0_9 = arith.constant 0 : index
    %14 = vector.load %arg4[%c0_8, %c0_9] : memref<128x128xf32, #tpu.memory_space<vmem>>, vector<128x128xf32>
    %cst_10 = arith.constant dense<0.000000e+00> : vector<16x128xf32>
    %15 = tpu.matmul %13, %14, %cst_10 {dimension_numbers = #tpu.dot_dimension_numbers<[1], [0], [0], [1], [0, 0, 1, 1], [], []>} : vector<16x128xf32>, vector<128x128xf32>, vector<16x128xf32> -> vector<16x128xf32>
    %c0_11 = arith.constant 0 : index
    %c0_12 = arith.constant 0 : index
    %16 = vector.load %arg5[%c0_11, %c0_12] : memref<1x128xf32, #tpu.memory_space<vmem>>, vector<1x128xf32>
    %17 = vector.broadcast %16 : vector<1x128xf32> to vector<16x128xf32>
    %18 = arith.addf %15, %17 : vector<16x128xf32>
    %c0_13 = arith.constant 0 : index
    %c0_14 = arith.constant 0 : index
    %19 = vector.load %arg6[%c0_13, %c0_14] : memref<16x128xf32, #tpu.memory_space<vmem>>, vector<16x128xf32>
    tpu.vector_store %arg6[%c0_13, %c0_14], %18 {strides = array<i32>} : memref<16x128xf32, #tpu.memory_space<vmem>>, vector<16x128xf32>,
    return
  }
  func.func @transform_0(%arg0: i32) -> (i32, i32) {
    %c0_i32 = arith.constant 0 : i32
    %c0_i32_0 = arith.constant 0 : i32
    return %arg0, %c0_i32 : i32, i32
  }
  func.func @transform_1(%arg0: i32) -> (i32, i32) {
    %c0_i32 = arith.constant 0 : i32
    %c0_i32_0 = arith.constant 0 : i32
    %c0_i32_1 = arith.constant 0 : i32
    return %c0_i32, %c0_i32_0 : i32, i32
  }
  func.func @transform_2(%arg0: i32) -> (i32, i32) {
    %c0_i32 = arith.constant 0 : i32
    %c0_i32_0 = arith.constant 0 : i32
    %c0_i32_1 = arith.constant 0 : i32
    return %c0_i32, %c0_i32_0 : i32, i32
  }
  func.func @transform_3(%arg0: i32) -> (i32, i32) {
    %c0_i32 = arith.constant 0 : i32
    %c0_i32_0 = arith.constant 0 : i32
    %c0_i32_1 = arith.constant 0 : i32
    return %c0_i32, %c0_i32_0 : i32, i32
  }
  func.func @transform_4(%arg0: i32) -> (i32, i32) {
    %c0_i32 = arith.constant 0 : i32
    %c0_i32_0 = arith.constant 0 : i32
    %c0_i32_1 = arith.constant 0 : i32
    return %c0_i32, %c0_i32_0 : i32, i32
  }
  func.func @transform_5(%arg0: i32) -> (i32, i32) {
    %c0_i32 = arith.constant 0 : i32
    %c0_i32_0 = arith.constant 0 : i32
    return %arg0, %c0_i32 : i32, i32
  }
}

</mosaic_0001>

<bundles_post_ra>
// kernel: mlp_pallas.1
= control target key start
LH: loop header
LB: loop body
LE: loop exit
PB: predicated region body
PF: predicated region fallthrough
CT: control target
= control target key end

     0   :  { %10 = vsyncpa [#allocation3], 0  ;;  %s767_s0 = inlined_call_operand.hbm [shape: f32[16,128], index: 0, kind: input, shape index: {}]   ;;  %s768_s1 = inlined_call_operand.hbm [shape: f32[128,128], index: 1, kind: input, shape index: {}]   ;;  %s769_s2 = inlined_call_operand.hbm [shape: f32[1,128], index: 2, kind: input, shape index: {}]   ;;  %s770_s3 = inlined_call_operand.hbm [shape: f32[128,128], index: 3, kind: input, shape index: {}]   ;;  %s771_s4 = inlined_call_operand.hbm [shape: f32[1,128], index: 4, kind: input, shape index: {}]   ;;  %s772_s5 = inlined_call_operand.hbm [shape: f32[16,128], index: 5, kind: output, shape index: {}]  }
   0x1   :  { %11 = vsyncpa [#allocation6], 0 }
   0x2   :  { %12 = vsyncpa [#allocation9], 0 }
   0x3   :  { %13 = vsyncpa [#allocation4], 0  ;;  %s638_s18 = smov [#allocation5]   ;;  %s639_s20 = smov [#allocation8]  }
   0x4   :  { %s31_s19 = sshll.u32 %s638_s18, 4  ;;  %s53_s21 = sshll.u32 %s639_s20, 4  ;;  %s32_s19 = int_to_ptr.vmem [resolvable:$true] %s31_s19  ;;  %s676_s21 = int_to_ptr.vmem [resolvable:$true] %s53_s21 }
   0x5   :  { %s498_s24 = scalar_lea.hbm %s768_s1, 2048 }
   0x6   :  { %p499_p0 = scmp.ne.s32.totalorder %s768_s1, %s498_s24  ;;  %p502_p1 = scmp.lt.u32.totalorder %s498_s24, %s768_s1 }
   0x8   :  { %p504_p2 = pnand %p502_p1, %p499_p0 }
   0xa   :  { %507 = shalt.err (!%p504_p2)
}
   0xb   :  { %s508_s29 = scalar_lea.vmem %s32_s19, 2048  ;;  %p513_p4 = scmp.lt.s32.totalorder %s32_s19, %s32_s19 }
   0xc   :  { %p509_p3 = scmp.ne.s32.totalorder %s32_s19, %s508_s29  ;;  %p514_p5 = scmp.lt.s32.totalorder %s508_s29, %s508_s29 }
   0xe   :  { %p515_p6 = por %p514_p5, %p513_p4 }
  0x10   :  { %p516_p7 = pnand %p515_p6, %p509_p3 }
  0x12   :  { %519 = shalt.err (!%p516_p7)
}
  0x13   :  { %s640_s30 = smov 128   ;;  %s641_s6 = smov 8  }
  0x14   :  { %37 = dma.hbm_to_vmem [thread:$0]  %s768_s1, 2048, %s32_s19, [#allocation6], %s640_s30, %s640_s30, %s641_s6  }
  0x15   :  { %s520_s11 = scalar_lea.hbm %s770_s3, 2048 }
  0x16   :  { %p521_p8 = scmp.ne.s32.totalorder %s770_s3, %s520_s11  ;;  %p524_p9 = scmp.lt.u32.totalorder %s520_s11, %s770_s3 }
  0x18   :  { %p526_p10 = pnand %p524_p9, %p521_p8 }
  0x1a   :  { %529 = shalt.err (!%p526_p10)
}
  0x1b   :  { %s530_s16 = scalar_lea.vmem %s676_s21, 2048  ;;  %p535_p12 = scmp.lt.s32.totalorder %s676_s21, %s676_s21 }
  0x1c   :  { %p531_p11 = scmp.ne.s32.totalorder %s676_s21, %s530_s16  ;;  %p536_p13 = scmp.lt.s32.totalorder %s530_s16, %s530_s16 }
  0x1e   :  { %p537_p0 = por %p536_p13, %p535_p12 }
  0x20   :  { %p538_p1 = pnand %p537_p0, %p531_p11 }
  0x22   :  { %541 = shalt.err (!%p538_p1)
}
  0x23   :  { %59 = dma.hbm_to_vmem [thread:$0]  %s770_s3, 2048, %s676_s21, [#allocation9], %s640_s30, %s640_s30, %s641_s6  }
  0x24   :  { %s642_s18 = smov [#allocation2]   ;;  %s643_s20 = smov [#allocation7]  }
  0x25   :  { %s19_s19 = sshll.u32 %s642_s18, 4  ;;  %s44_s22 = sshll.u32 %s643_s20, 4  ;;  %s20_s19 = int_to_ptr.vmem [resolvable:$true] %s19_s19  ;;  %s45_s22 = int_to_ptr.vmem [resolvable:$true] %s44_s22 }
  0x26   :  { %s542_s25 = scalar_lea.hbm %s767_s0, 256 }
  0x27   :  { %p543_p2 = scmp.ne.s32.totalorder %s767_s0, %s542_s25  ;;  %p546_p3 = scmp.lt.u32.totalorder %s542_s25, %s767_s0 }
  0x29   :  { %p548_p4 = pnand %p546_p3, %p543_p2 }
  0x2b   :  { %551 = shalt.err (!%p548_p4)
}
  0x2c   :  { %s552_s3 = scalar_lea.vmem %s20_s19, 256  ;;  %p557_p6 = scmp.lt.s32.totalorder %s20_s19, %s20_s19 }
  0x2d   :  { %p553_p5 = scmp.ne.s32.totalorder %s20_s19, %s552_s3  ;;  %p558_p7 = scmp.lt.s32.totalorder %s552_s3, %s552_s3 }
  0x2f   :  { %p559_p8 = por %p558_p7, %p557_p6 }
  0x31   :  { %p560_p9 = pnand %p559_p8, %p553_p5 }
  0x33   :  { %563 = shalt.err (!%p560_p9)
}
  0x34   :  { %25 = dma.hbm_to_vmem [thread:$0]  %s767_s0, 256, %s20_s19, [#allocation3], %s640_s30, %s640_s30, %s641_s6  }
  0x35   :  { %s564_s10 = scalar_lea.hbm %s769_s2, 16 }
  0x36   :  { %p565_p10 = scmp.ne.s32.totalorder %s769_s2, %s564_s10  ;;  %p568_p11 = scmp.lt.u32.totalorder %s564_s10, %s769_s2 }
  0x38   :  { %p570_p12 = pnand %p568_p11, %p565_p10 }
  0x3a   :  { %573 = shalt.err (!%p570_p12)
}
  0x3b   :  { %s574_s15 = scalar_lea.vmem %s45_s22, 16  ;;  %s578_s16 = scalar_lea.vmem %s45_s22, 32 }
  0x3c   :  { %p575_p13 = scmp.ne.s32.totalorder %s45_s22, %s574_s15  ;;  %p579_p0 = scmp.lt.s32.totalorder %s45_s22, %s45_s22 }
  0x3d   :  { %p580_p1 = scmp.lt.s32.totalorder %s578_s16, %s574_s15 }
  0x3f   :  { %p581_p2 = por %p580_p1, %p579_p0 }
  0x41   :  { %p582_p3 = pnand %p581_p2, %p575_p13 }
  0x43   :  { %585 = shalt.err (!%p582_p3)
}
  0x44   :  { %47 = dma.hbm_to_vmem [thread:$0]  %s769_s2, 16, %s45_s22, [#allocation6]  }
  0x45   :  { %s644_s17 = smov [#allocation10]   ;;  %s586_s23 = scalar_lea.hbm %s771_s4, 16 }
  0x46   :  { %s66_s18 = sshll.u32 %s644_s17, 4  ;;  %p587_p4 = scmp.ne.s32.totalorder %s771_s4, %s586_s23  ;;  %s67_s18 = int_to_ptr.vmem [resolvable:$true] %s66_s18 }
  0x47   :  { %p590_p5 = scmp.lt.u32.totalorder %s586_s23, %s771_s4 }
  0x49   :  { %p592_p6 = pnand %p590_p5, %p587_p4 }
  0x4b   :  { %595 = shalt.err (!%p592_p6)
}
  0x4c   :  { %s596_s28 = scalar_lea.vmem %s67_s18, 16  ;;  %s600_s2 = scalar_lea.vmem %s67_s18, 32 }
  0x4d   :  { %p597_p7 = scmp.ne.s32.totalorder %s67_s18, %s596_s28  ;;  %p601_p8 = scmp.lt.s32.totalorder %s67_s18, %s67_s18 }
  0x4e   :  { %p602_p9 = scmp.lt.s32.totalorder %s600_s2, %s596_s28 }
  0x50   :  { %p603_p10 = por %p602_p9, %p601_p8 }
  0x52   :  { %p604_p11 = pnand %p603_p10, %p597_p7 }
  0x54   :  { %607 = shalt.err (!%p604_p11)
}
  0x55   :  { %69 = dma.hbm_to_vmem [thread:$0]  %s771_s4, 16, %s67_s18, [#allocation9]  }
  0x56   :  { %630 = dma.done.wait [#allocation3], 256  }
  0x57   :  { %631 = vsyncadd [#allocation3], 4294967040 }
  0x58   :  { %632 = dma.done.wait [#allocation6], 2064  }
  0x59   :  { %633 = vsyncadd [#allocation6], 4294965232 }
  0x5a   :  { %634 = dma.done.wait [#allocation9], 2064  }
  0x5b   :  { %635 = vsyncadd [#allocation9], 4294965232  ;;  %v87_v0 = vld [vmem:[#allocation5] sm:$0xff]  ;;  %v88_v1 = vld [vmem:[#allocation5 + $0x8] sm:$0xff]  ;;  %s645_s4 = smov [#allocation11]  }
  0x5c   :  { %v89_v2 = vld [vmem:[#allocation5 + $0x10] sm:$0xff]  ;;  %v422_v3 = vpack.c.bf16 %v88_v1, %v87_v0  ;;  %v90_v4 = vld [vmem:[#allocation5 + $0x18] sm:$0xff]  ;;  %v91_v6 = vld [vmem:[#allocation5 + $0x20] sm:$0xff]  ;;  %s300_s3 = sshll.u32 %s645_s4, 4  ;;  %s301_s3 = int_to_ptr.vmem [resolvable:$true] %s300_s3 }
  0x5d   :  { %v426_v5 = vpack.c.bf16 %v90_v4, %v89_v2  ;;  %v92_v7 = vld [vmem:[#allocation5 + $0x28] sm:$0xff]  ;;  %v93_v9 = vld [vmem:[#allocation5 + $0x30] sm:$0xff]  ;;  %v94_v10 = vld [vmem:[#allocation5 + $0x38] sm:$0xff]  ;;  %s608_s21 = scalar_lea.vmem %s301_s3, 256  ;;  %p613_p13 = scmp.lt.s32.totalorder %s301_s3, %s301_s3 }
  0x5e   :  { %423 = vmatprep.subr.bf16.mxu0 %v422_v3  ;;  %v430_v8 = vpack.c.bf16 %v92_v7, %v91_v6  ;;  %v85_v11 = vld [vmem:[#allocation2] sm:$0xff]  ;;  %v195_v12 = vld [vmem:[#allocation8] sm:$0xff]  ;;  %v198_v16 = vld [vmem:[#allocation8 + $0x18] sm:$0xff]  ;;  %v434_v20 = vpack.c.bf16 %v94_v10, %v93_v9  ;;  %p609_p12 = scmp.ne.s32.totalorder %s301_s3, %s608_s21  ;;  %p614_p0 = scmp.lt.s32.totalorder %s608_s21, %s608_s21 }
  0x5f   :  { %425 = vmatpush3.bf16.msra.mxu0 %v422_v3  ;;  %384 = vmatprep.mubr.f32.mxu0 %v85_v11  ;;  %v196_v13 = vld [vmem:[#allocation8 + $0x8] sm:$0xff]  ;;  %v197_v14 = vld [vmem:[#allocation8 + $0x10] sm:$0xff]  ;;  %v199_v18 = vld [vmem:[#allocation8 + $0x20] sm:$0xff] }
  0x60   :  { %427 = vmatprep.subr.bf16.mxu0 %v426_v5  ;;  %v454_v15 = vpack.c.bf16 %v196_v13, %v195_v12  ;;  %v458_v17 = vpack.c.bf16 %v198_v16, %v197_v14  ;;  %v200_v19 = vld [vmem:[#allocation8 + $0x28] sm:$0xff]  ;;  %v95_v21 = vld [vmem:[#allocation5 + $0x40] sm:$0xff]  ;;  %v98_v26 = vld [vmem:[#allocation5 + $0x58] sm:$0xff]  ;;  %p615_p1 = por %p614_p0, %p613_p13 }
  0x61   :  { %v96_v22 = vld [vmem:[#allocation5 + $0x48] sm:$0xff]  ;;  %v462_v23 = vpack.c.bf16 %v200_v19, %v199_v18  ;;  %v97_v25 = vld [vmem:[#allocation5 + $0x50] sm:$0xff]  ;;  %v99_v28 = vld [vmem:[#allocation5 + $0x60] sm:$0xff] }
  0x62   :  { %455 = vmatprep.subr.bf16.mxu1 %v454_v15  ;;  %v438_v24 = vpack.c.bf16 %v96_v22, %v95_v21  ;;  %v442_v27 = vpack.c.bf16 %v98_v26, %v97_v25  ;;  %v100_v29 = vld [vmem:[#allocation5 + $0x68] sm:$0xff]  ;;  %v101_v31 = vld [vmem:[#allocation5 + $0x70] sm:$0xff]  ;;  %v102_v32 = vld [vmem:[#allocation5 + $0x78] sm:$0xff]  ;;  %p616_p2 = pnand %p615_p1, %p609_p12 }
  0x63   :  { %429 = vmatpush3.bf16.msra.mxu0 %v426_v5  ;;  %457 = vmatpush3.bf16.msra.mxu1 %v454_v15  ;;  %v446_v30 = vpack.c.bf16 %v100_v29, %v99_v28  ;;  %v450_v33 = vpack.c.bf16 %v102_v32, %v101_v31  ;;  %v86_v34 = vld [vmem:[#allocation2 + $0x8] sm:$0xff]  ;;  %v203_v38 = vld [vmem:[#allocation8 + $0x40] sm:$0xff]  ;;  %v204_v39 = vld [vmem:[#allocation8 + $0x48] sm:$0xff] }
  0x64   :  { %431 = vmatprep.subr.bf16.mxu0 %v430_v8  ;;  %459 = vmatprep.subr.bf16.mxu1 %v458_v17  ;;  %v201_v35 = vld [vmem:[#allocation8 + $0x30] sm:$0xff]  ;;  %v202_v36 = vld [vmem:[#allocation8 + $0x38] sm:$0xff]  ;;  %v470_v40 = vpack.c.bf16 %v204_v39, %v203_v38  ;;  %v207_v44 = vld [vmem:[#allocation8 + $0x60] sm:$0xff] }
  0x65   :  { %v466_v37 = vpack.c.bf16 %v202_v36, %v201_v35  ;;  %v205_v41 = vld [vmem:[#allocation8 + $0x50] sm:$0xff]  ;;  %v206_v42 = vld [vmem:[#allocation8 + $0x58] sm:$0xff]  ;;  %v208_v45 = vld [vmem:[#allocation8 + $0x68] sm:$0xff] }
  0x66   :  { %v474_v43 = vpack.c.bf16 %v206_v42, %v205_v41  ;;  %v478_v46 = vpack.c.bf16 %v208_v45, %v207_v44  ;;  %v209_v47 = vld [vmem:[#allocation8 + $0x70] sm:$0xff]  ;;  %v210_v48 = vld [vmem:[#allocation8 + $0x78] sm:$0xff]  ;;  %v315_v1 = vld [vmem:[#allocation10] ss:$0 sm:$0xff] }
  0x67   :  { %433 = vmatpush3.bf16.msra.mxu0 %v430_v8  ;;  %461 = vmatpush3.bf16.msra.mxu1 %v458_v17  ;;  %v482_v49 = vpack.c.bf16 %v210_v48, %v209_v47  ;;  %v314_v50 = vld [vmem:[#allocation7] ss:$0 sm:$0xff] }
  0x68   :  { %435 = vmatprep.subr.bf16.mxu0 %v434_v20  ;;  %463 = vmatprep.subr.bf16.mxu1 %v462_v23 }
  0x6b   :  { %437 = vmatpush3.bf16.msra.mxu0 %v434_v20  ;;  %465 = vmatpush3.bf16.msra.mxu1 %v462_v23 }
  0x6c   :  { %439 = vmatprep.subr.bf16.mxu0 %v438_v24  ;;  %467 = vmatprep.subr.bf16.mxu1 %v466_v37 }
  0x6f   :  { %441 = vmatpush3.bf16.msra.mxu0 %v438_v24  ;;  %469 = vmatpush3.bf16.msra.mxu1 %v466_v37 }
  0x70   :  { %443 = vmatprep.subr.bf16.mxu0 %v442_v27  ;;  %471 = vmatprep.subr.bf16.mxu1 %v470_v40 }
  0x73   :  { %445 = vmatpush3.bf16.msra.mxu0 %v442_v27  ;;  %473 = vmatpush3.bf16.msra.mxu1 %v470_v40 }
  0x74   :  { %447 = vmatprep.subr.bf16.mxu0 %v446_v30  ;;  %475 = vmatprep.subr.bf16.mxu1 %v474_v43 }
  0x77   :  { %449 = vmatpush3.bf16.msra.mxu0 %v446_v30  ;;  %477 = vmatpush3.bf16.msra.mxu1 %v474_v43 }
  0x78   :  { %451 = vmatprep.subr.bf16.mxu0 %v450_v33  ;;  %479 = vmatprep.subr.bf16.mxu1 %v478_v46 }
  0x7b   :  { %453 = vmatpush3.bf16.msra.mxu0 %v450_v33  ;;  %481 = vmatpush3.bf16.msra.mxu1 %v478_v46 }
  0x7c   :  { %483 = vmatprep.subr.bf16.mxu1 %v482_v49 }
  0x7e   :  { %385 = vmatmul.mubr.f32.vlgmr.msra.gmra.mrb[0].mxu0 %v86_v34 }
  0x7f   :  { %485 = vmatpush3.bf16.msra.mxu1 %v482_v49 }
 0x151   :  { %v386_v51 = vpop.f32.mrb[0].mxu0 }
 0x152   :  { %v182_v52 = vadd.f32 %v386_v51, %v314_v50  ;;  %v176_v53 = vpop.f32.mrb[1].mxu0 }
 0x153   :  { %v177_v54 = vadd.f32 %v314_v50, %v176_v53 }
 0x154   :  { %v188_v55 = vmul.f32 0.70710677, %v182_v52  ;;  %v186_v62 = vmul.f32 0.5, %v182_v52 }
 0x155   :  { %v187_v56 = vmul.f32 0.70710677, %v177_v54  ;;  %v185_v60 = vmul.f32 0.5, %v177_v54 }
 0x156   :  { %494 = verf.f32 %v188_v55 }
 0x157   :  { %496 = verf.f32 %v187_v56 }
 0x160   :  { %v495_v57 = vpop.eup %494 }
 0x161   :  { %v497_v58 = vpop.eup %496  ;;  %v192_v59 = vadd.f32 1.0, %v495_v57 }
 0x162   :  { %v191_v61 = vadd.f32 1.0, %v497_v58 }
 0x163   :  { %v194_v0 = vmul.f32 %v192_v59, %v186_v62 }
 0x164   :  { %v193_v63 = vmul.f32 %v191_v61, %v185_v60 }
 0x166   :  { %419 = vmatprep.mubr.f32.mxu1 %v193_v63 }
 0x167   :  { %420 = vmatmul.mubr.f32.vlgmr.msra.gmra.mrb[0].mxu1 %v194_v0 }
 0x23a   :  { %v421_v2 = vpop.f32.mrb[0].mxu1 }
 0x23b   :  { %v290_v3 = vadd.f32 %v421_v2, %v315_v1  ;;  %v284_v4 = vpop.f32.mrb[1].mxu1 }
 0x23c   :  { %v285_v5 = vadd.f32 %v315_v1, %v284_v4 }
 0x23d   :  { %294 = vst [vmem:[#allocation11 + $0x8] sm:$0xff] %v290_v3 }
 0x23e   :  { %293 = vst [vmem:[#allocation11] sm:$0xff] %v285_v5 }
 0x23f   :  { %619 = shalt.err (!%p616_p2)
}
 0x240   :  { %s620_s9 = scalar_lea.hbm %s772_s5, 256 }
 0x241   :  { %p621_p3 = scmp.ne.s32.totalorder %s772_s5, %s620_s9  ;;  %p624_p4 = scmp.lt.u32.totalorder %s620_s9, %s772_s5 }
 0x243   :  { %p626_p5 = pnand %p624_p4, %p621_p3 }
 0x245   :  { %629 = shalt.err (!%p626_p5)
}
 0x246   :  { %306 = dma.vmem_to_hbm [thread:$0]  %s301_s3, 256, %s772_s5, [#allocation4], %s640_s30, %s640_s30, %s641_s6  }
 0x247   :  { %636 = dma.done.wait [#allocation4], 256  }
 0x248   :  { %637 = vsyncadd [#allocation4], 4294967040 }
 0x249   :  { %310 = vsyncpa [#allocation3], 1 }
 0x24a   :  { %311 = vsyncpa [#allocation6], 1 }
 0x24b   :  { %312 = vsyncpa [#allocation9], 1 }
 0x24c   :  { %313 = vsyncpa [#allocation4], 1 }

</bundles_post_ra>
